<compile_context>
chip_gen: v5e
topology: v5e:2x2
jax: 0.10.0
libtpu: 0.0.40
codegen_flags: <defaults>
</compile_context>

<pallas_src>
import functools
import math

import jax
import jax.numpy as jnp
from jax import lax
from jax.experimental import pallas as pl
from jax.experimental.pallas import tpu as pltpu


def _pick_tq(L, max_tq):
    """Largest multiple-of-8 divisor of L that is <= max_tq (fallback: L)."""
    best = L
    for cand in range(8, min(max_tq, L) + 1, 8):
        if L % cand == 0:
            best = cand
    return best


def mha_kernel(x_ref, bias_ref, wqkv_ref, wo_ref, o_ref, kv_ref, ctx_ref,
               *, n_head, d_qkv, tq):
    H = n_head * d_qkv
    qi = pl.program_id(1)

    # K/V projection for the whole sequence, once per batch (first q tile).
    # kv_ref persists across the q-tile grid axis (marked "arbitrary").
    @pl.when(qi == 0)
    def _():
        x_full = x_ref[0]                                     # (L, d_model)
        kv = jnp.dot(x_full, wqkv_ref[:, H:3 * H],
                     preferred_element_type=jnp.float32)      # (L, 2H) f32 acc
        kv_ref[...] = kv.astype(kv_ref.dtype)

    # Q projection for this query tile only.  The 1/sqrt(d_qkv) scale is
    # already folded into the Q columns of w_qkv by the wrapper.
    q_start = pl.multiple_of(qi * tq, 8)
    x_tile = x_ref[0, pl.ds(q_start, tq), :]                  # (tq, d_model)
    q = jnp.dot(x_tile, wqkv_ref[:, 0:H],
                preferred_element_type=jnp.float32).astype(kv_ref.dtype)

    bias = bias_ref[0]                                        # (1, L) f32 additive

    # Per-head attention (static loop).  d_qkv=32 column slices are narrower
    # than a 128-lane vreg; ctx is staged through an f32 VMEM scratch so the
    # output projection runs as one full-depth (K = H) MXU matmul.
    for h in range(n_head):
        sl = slice(h * d_qkv, (h + 1) * d_qkv)
        qh = q[:, sl]                                         # (tq, d_qkv)
        kh = kv_ref[:, sl]                                    # (L,  d_qkv)
        vh = kv_ref[:, H + h * d_qkv: H + (h + 1) * d_qkv]    # (L,  d_qkv)

        # Contract d_qkv directly -- no explicit K transpose materialized.
        scores = lax.dot_general(qh, kh, (((1,), (1,)), ((), ())),
                                 preferred_element_type=jnp.float32)  # (tq, L)
        scores = scores + bias

        # Softmax in f32; EUP approx reciprocal for the denominator.
        m = jnp.max(scores, axis=-1, keepdims=True)
        e = jnp.exp(scores - m)
        attn = e * pl.reciprocal(jnp.sum(e, axis=-1, keepdims=True), approx=True)
        # (dropout: eval-mode identity)

        ctx_ref[:, sl] = jnp.dot(attn.astype(vh.dtype), vh,
                                 preferred_element_type=jnp.float32)  # (tq, d_qkv)

    # Single wide output projection == sum over heads of ctx_h @ w_o[h].
    out = jnp.dot(ctx_ref[...].astype(wo_ref.dtype), wo_ref[...],
                  preferred_element_type=jnp.float32)         # (tq, d_model)
    o_ref[0] = out.astype(o_ref.dtype)


def multi_head_attention(x, key_padding_mask, w_q, w_k, w_v, w_o,
                         *, compute_dtype=jnp.float32, max_tq=256):
    """x: [B, L, d_model] f32; key_padding_mask: [B, L] bool (True = masked key)."""
    B, L, d_model = x.shape
    n_head, _, d_qkv = w_q.shape
    H = n_head * d_qkv

    tq = _pick_tq(L, max_tq)
    n_q_tiles = L // tq

    # --- Layout / dtype plumbing, done once in the wrapper (not per grid step) ---
    scale = jnp.float32(1.0 / math.sqrt(d_qkv))
    wq_cat = jnp.transpose(w_q, (1, 0, 2)).reshape(d_model, H) * scale  # scale folded into Q
    wk_cat = jnp.transpose(w_k, (1, 0, 2)).reshape(d_model, H)
    wv_cat = jnp.transpose(w_v, (1, 0, 2)).reshape(d_model, H)
    w_qkv = jnp.concatenate([wq_cat, wk_cat, wv_cat], axis=-1).astype(compute_dtype)
    wo_cat = w_o.reshape(H, d_model).astype(compute_dtype)
    x_c = x.astype(compute_dtype)

    # Additive mask bias.  NOTE: a row with ALL keys masked differs slightly
    # from the PyTorch masked_fill(-1e9) semantics (there: uniform 1/L attn).
    bias = jnp.where(key_padding_mask, jnp.float32(-1e9),
                     jnp.float32(0.0)).reshape(B, 1, L)

    itemsize = jnp.dtype(compute_dtype).itemsize

    # Explicit VMEM budget from the actual block footprint (+headroom), clamped
    # to stay within v7x's 64 MiB physical VMEM.
    vmem_est = (
        2 * L * d_model * itemsize            # x block (double-buffered)
        + 2 * L * 4                           # mask bias
        + 2 * d_model * 3 * H * itemsize      # fused w_qkv
        + 2 * H * d_model * itemsize          # w_o
        + 2 * tq * d_model * 4                # output tile (f32)
        + L * 2 * H * itemsize                # kv scratch
        + tq * H * 4                          # ctx scratch (f32)
        + 4 * tq * L * 4                      # scores / exp temporaries (f32)
        + 2 * tq * 3 * H * 4                  # q / misc temporaries
    )
    vmem_limit = int(min(max(2 * vmem_est, 32 * 1024 * 1024), 64 * 1024 * 1024))

    cost = pl.CostEstimate(
        flops=int(2 * B * (L * d_model * 3 * H + 2 * L * L * H + L * H * d_model)),
        transcendentals=int(B * n_head * L * L),
        bytes_accessed=int(B * L * d_model * (itemsize + 4) + B * L * 4
                           + d_model * 3 * H * itemsize + H * d_model * itemsize),
    )

    kernel = functools.partial(mha_kernel, n_head=n_head, d_qkv=d_qkv, tq=tq)

    return pl.pallas_call(
        kernel,
        out_shape=jax.ShapeDtypeStruct((B, L, d_model), jnp.float32),
        grid_spec=pltpu.PrefetchScalarGridSpec(
            num_scalar_prefetch=0,
            grid=(B, n_q_tiles),
            in_specs=[
                # Full-length x per batch (constant over the q-tile axis ->
                # DMA'd once per batch, hidden behind the q-tile steps).
                pl.BlockSpec((1, L, d_model), lambda b, qi: (b, 0, 0)),   # x
                pl.BlockSpec((1, 1, L), lambda b, qi: (b, 0, 0)),         # mask bias
                # Constant index_map -> loaded once, VMEM-resident.
                pl.BlockSpec((d_model, 3 * H), lambda b, qi: (0, 0)),     # fused w_qkv
                pl.BlockSpec((H, d_model), lambda b, qi: (0, 0)),         # w_o
            ],
            out_specs=pl.BlockSpec((1, tq, d_model), lambda b, qi: (b, qi, 0)),
            scratch_shapes=[
                pltpu.VMEM((L, 2 * H), compute_dtype),   # K|V for the full sequence
                pltpu.VMEM((tq, H), jnp.float32),        # per-tile ctx (all heads)
            ],
        ),
        compiler_params=pltpu.CompilerParams(
            # Batch axis independent (megacore-shardable); q-tile axis carries
            # the K/V scratch so it must stay sequential.
            dimension_semantics=("parallel", "arbitrary"),
            vmem_limit_bytes=vmem_limit),
        cost_estimate=cost,
    )(x_c, bias, w_qkv, wo_cat)


def mha_reference(x, key_padding_mask, w_q, w_k, w_v, w_o):
    """Pure-JAX reference mirroring the PyTorch forward (eval-mode dropout)."""
    d_qkv = w_q.shape[-1]
    Q = jnp.einsum('blm,nmd->bnld', x, w_q)
    K = jnp.einsum('blm,nmd->bnld', x, w_k)
    V = jnp.einsum('blm,nmd->bnld', x, w_v)
    scores = jnp.einsum('bnld,bnkd->bnlk', Q, K) / math.sqrt(d_qkv)
    scores = jnp.where(key_padding_mask[:, None, None, :], -1000000000.0, scores)
    attn = jax.nn.softmax(scores, axis=-1)
    ctx = jnp.einsum('bnlk,bnkd->bnld', attn, V)
    return jnp.einsum('bnld,ndm->blm', ctx, w_o)


if __name__ == "__main__":
    # Module defaults: d_model=256, n_head=4, d_qkv=32 (lane-dense output).
    d_model, n_head, d_qkv = 256, 4, 32

    key = jax.random.PRNGKey(0)
    kq, kk, kv, ko, kx1, kx2 = jax.random.split(key, 6)

    # Deterministic xavier-normal-style init (synthetic, not a checkpoint load).
    std_qkv = math.sqrt(2.0 / (d_model * d_qkv + n_head * d_qkv))
    std_o = math.sqrt(2.0 / (d_qkv * d_model + n_head * d_model))
    w_q = std_qkv * jax.random.normal(kq, (n_head, d_model, d_qkv), jnp.float32)
    w_k = std_qkv * jax.random.normal(kk, (n_head, d_model, d_qkv), jnp.float32)
    w_v = std_qkv * jax.random.normal(kv, (n_head, d_model, d_qkv), jnp.float32)
    w_o = std_o * jax.random.normal(ko, (n_head, d_qkv, d_model), jnp.float32)

    # --- Config 1: small shapes, single q tile ---------------------------------
    B, L = 2, 8
    x = jax.random.normal(kx1, (B, L, d_model), dtype=jnp.float32)
    key_padding = jnp.zeros((B, L), dtype=bool).at[1, -2:].set(True)

    ref = mha_reference(x, key_padding, w_q, w_k, w_v, w_o)

    out_f32 = jax.block_until_ready(
        multi_head_attention(x, key_padding, w_q, w_k, w_v, w_o))
    assert out_f32.shape == (B, L, d_model)
    assert jnp.allclose(out_f32, ref, rtol=2e-3, atol=2e-3), "f32 mismatch vs reference"

    out_bf16 = jax.block_until_ready(
        multi_head_attention(x, key_padding, w_q, w_k, w_v, w_o,
                             compute_dtype=jnp.bfloat16))
    assert jnp.allclose(out_bf16, ref, rtol=5e-2, atol=1e-2), "bf16 mismatch vs reference"

    # --- Config 2: exercise the q-tile grid axis (n_q_tiles > 1) ---------------
    B2, L2 = 2, 32
    x2 = jax.random.normal(kx2, (B2, L2, d_model), dtype=jnp.float32)
    key_padding2 = jnp.zeros((B2, L2), dtype=bool).at[0, -5:].set(True).at[1, -11:].set(True)

    ref2 = mha_reference(x2, key_padding2, w_q, w_k, w_v, w_o)
    out2 = jax.block_until_ready(
        multi_head_attention(x2, key_padding2, w_q, w_k, w_v, w_o, max_tq=16))
    assert out2.shape == (B2, L2, d_model)
    assert jnp.allclose(out2, ref2, rtol=2e-3, atol=2e-3), "tiled f32 mismatch vs reference"

    print("KERNEL_OK")
</pallas_src>

<mosaic_0001>
module attributes {stable_mosaic.version = 11 : i64} {
  func.func @mha_kernel(%arg0: i32, %arg1: i32, %arg2: memref<1x8x256xf32, #tpu.memory_space<vmem>>, %arg3: memref<1x1x8xf32, #tpu.memory_space<vmem>>, %arg4: memref<256x384xf32, #tpu.memory_space<vmem>>, %arg5: memref<128x256xf32, #tpu.memory_space<vmem>>, %arg6: memref<1x8x256xf32, #tpu.memory_space<vmem>>, %arg7: memref<8x256xf32, #tpu.memory_space<vmem>>, %arg8: memref<8x128xf32, #tpu.memory_space<vmem>>) attributes {dimension_semantics = [#tpu.dimension_semantics<parallel>, #tpu.dimension_semantics<arbitrary>], iteration_bounds = array<i64: 2, 1>, scalar_prefetch = 0 : i64, scratch_operands = 2 : i64, tpu.core_type = #tpu.core_type<tc>, window_params = [{transform_indices = @transform_0, window_bounds = array<i64: 1, 8, 256>}, {transform_indices = @transform_1, window_bounds = array<i64: 1, 1, 8>}, {pipeline_mode = #tpu.pipeline_mode<synchronous>, transform_indices = @transform_2, window_bounds = array<i64: 256, 384>}, {pipeline_mode = #tpu.pipeline_mode<synchronous>, transform_indices = @transform_3, window_bounds = array<i64: 128, 256>}, {transform_indices = @transform_4, window_bounds = array<i64: 1, 8, 256>}]} {
    %c0_i32 = arith.constant 0 : i32
    %0 = arith.cmpi eq, %arg1, %c0_i32 : i32
    %1 = arith.extui %0 : i1 to i32
    %c0_i32_0 = arith.constant 0 : i32
    %2 = arith.cmpi ne, %1, %c0_i32_0 : i32
    scf.if %2 {
      %c0_48 = arith.constant 0 : index
      %c0_49 = arith.constant 0 : index
      %c0_50 = arith.constant 0 : index
      %90 = vector.load %arg2[%c0_48, %c0_49, %c0_50] : memref<1x8x256xf32, #tpu.memory_space<vmem>>, vector<1x8x256xf32>
      %91 = vector.shape_cast %90 : vector<1x8x256xf32> to vector<8x256xf32>
      %c0_51 = arith.constant 0 : index
      %c128_52 = arith.constant 128 : index
      %92 = vector.load %arg4[%c0_51, %c128_52] : memref<256x384xf32, #tpu.memory_space<vmem>>, vector<256x256xf32>
      %cst_53 = arith.constant dense<0.000000e+00> : vector<8x256xf32>
      %93 = tpu.matmul %91, %92, %cst_53 {dimension_numbers = #tpu.dot_dimension_numbers<[1], [0], [0], [1], [0, 0, 1, 1], [], []>} : vector<8x256xf32>, vector<256x256xf32>, vector<8x256xf32> -> vector<8x256xf32>
      %c0_54 = arith.constant 0 : index
      %c0_55 = arith.constant 0 : index
      %94 = vector.load %arg7[%c0_54, %c0_55] : memref<8x256xf32, #tpu.memory_space<vmem>>, vector<8x256xf32>
      tpu.vector_store %arg7[%c0_54, %c0_55], %93 {strides = array<i32>} : memref<8x256xf32, #tpu.memory_space<vmem>>, vector<8x256xf32>,
    } else {
    }
    %c8_i32 = arith.constant 8 : i32
    %3 = arith.muli %arg1, %c8_i32 : i32
    %4 = tpu.assume_multiple %3, 8 : i32
    %c0 = arith.constant 0 : index
    %5 = arith.index_cast %4 : i32 to index
    %c0_1 = arith.constant 0 : index
    %6 = vector.load %arg2[%c0, %5, %c0_1] : memref<1x8x256xf32, #tpu.memory_space<vmem>>, vector<1x8x256xf32>
    %7 = vector.shape_cast %6 : vector<1x8x256xf32> to vector<8x256xf32>
    %c0_2 = arith.constant 0 : index
    %c0_3 = arith.constant 0 : index
    %8 = vector.load %arg4[%c0_2, %c0_3] : memref<256x384xf32, #tpu.memory_space<vmem>>, vector<256x128xf32>
    %cst = arith.constant dense<0.000000e+00> : vector<8x128xf32>
    %9 = tpu.matmul %7, %8, %cst {dimension_numbers = #tpu.dot_dimension_numbers<[1], [0], [0], [1], [0, 0, 1, 1], [], []>} : vector<8x256xf32>, vector<256x128xf32>, vector<8x128xf32> -> vector<8x128xf32>
    %c0_4 = arith.constant 0 : index
    %c0_5 = arith.constant 0 : index
    %c0_6 = arith.constant 0 : index
    %10 = vector.load %arg3[%c0_4, %c0_5, %c0_6] : memref<1x1x8xf32, #tpu.memory_space<vmem>>, vector<1x1x8xf32>
    %11 = vector.shape_cast %10 : vector<1x1x8xf32> to vector<1x8xf32>
    %12 = vector.extract_strided_slice %9 {offsets = [0, 0], sizes = [8, 32], strides = [1, 1]} : vector<8x128xf32> to vector<8x32xf32>
    %c0_7 = arith.constant 0 : index
    %c0_8 = arith.constant 0 : index
    %13 = vector.load %arg7[%c0_7, %c0_8] : memref<8x256xf32, #tpu.memory_space<vmem>>, vector<8x32xf32>
    %c0_9 = arith.constant 0 : index
    %c128 = arith.constant 128 : index
    %14 = vector.load %arg7[%c0_9, %c128] : memref<8x256xf32, #tpu.memory_space<vmem>>, vector<8x32xf32>
    %cst_10 = arith.constant dense<0.000000e+00> : vector<8x8xf32>
    %15 = tpu.matmul %12, %13, %cst_10 {dimension_numbers = #tpu.dot_dimension_numbers<[1], [1], [0], [0], [0, 0, 1, 0], [], []>} : vector<8x32xf32>, vector<8x32xf32>, vector<8x8xf32> -> vector<8x8xf32>
    %16 = vector.broadcast %11 : vector<1x8xf32> to vector<8x8xf32>
    %17 = arith.addf %15, %16 : vector<8x8xf32>
    %cst_11 = arith.constant dense<0xFF800000> : vector<8xf32>
    %18 = vector.multi_reduction <maximumf>, %17, %cst_11 [1] : vector<8x8xf32> to vector<8xf32>
    %19 = vector.shape_cast %18 : vector<8xf32> to vector<8x1xf32>
    %20 = vector.broadcast %19 : vector<8x1xf32> to vector<8x8xf32>
    %21 = arith.subf %17, %20 : vector<8x8xf32>
    %22 = math.exp %21 : vector<8x8xf32>
    %cst_12 = arith.constant dense<0.000000e+00> : vector<8xf32>
    %23 = vector.multi_reduction <add>, %22, %cst_12 [1] : vector<8x8xf32> to vector<8xf32>
    %24 = vector.shape_cast %23 : vector<8xf32> to vector<8x1xf32>
    %25 = tpu.reciprocal %24 {approx = true} : vector<8x1xf32> -> vector<8x1xf32>
    %26 = vector.broadcast %25 : vector<8x1xf32> to vector<8x8xf32>
    %27 = arith.mulf %22, %26 : vector<8x8xf32>
    %cst_13 = arith.constant dense<0.000000e+00> : vector<8x32xf32>
    %28 = tpu.matmul %27, %14, %cst_13 {dimension_numbers = #tpu.dot_dimension_numbers<[1], [0], [0], [1], [0, 0, 1, 1], [], []>} : vector<8x8xf32>, vector<8x32xf32>, vector<8x32xf32> -> vector<8x32xf32>
    %c0_14 = arith.constant 0 : index
    %c0_15 = arith.constant 0 : index
    %29 = vector.load %arg8[%c0_14, %c0_15] : memref<8x128xf32, #tpu.memory_space<vmem>>, vector<8x32xf32>
    tpu.vector_store %arg8[%c0_14, %c0_15], %28 {strides = array<i32>} : memref<8x128xf32, #tpu.memory_space<vmem>>, vector<8x32xf32>,
    %30 = vector.extract_strided_slice %9 {offsets = [0, 32], sizes = [8, 32], strides = [1, 1]} : vector<8x128xf32> to vector<8x32xf32>
    %c0_16 = arith.constant 0 : index
    %c32 = arith.constant 32 : index
    %31 = vector.load %arg7[%c0_16, %c32] : memref<8x256xf32, #tpu.memory_space<vmem>>, vector<8x32xf32>
    %c0_17 = arith.constant 0 : index
    %c160 = arith.constant 160 : index
    %32 = vector.load %arg7[%c0_17, %c160] : memref<8x256xf32, #tpu.memory_space<vmem>>, vector<8x32xf32>
    %cst_18 = arith.constant dense<0.000000e+00> : vector<8x8xf32>
    %33 = tpu.matmul %30, %31, %cst_18 {dimension_numbers = #tpu.dot_dimension_numbers<[1], [1], [0], [0], [0, 0, 1, 0], [], []>} : vector<8x32xf32>, vector<8x32xf32>, vector<8x8xf32> -> vector<8x8xf32>
    %34 = vector.broadcast %11 : vector<1x8xf32> to vector<8x8xf32>
    %35 = arith.addf %33, %34 : vector<8x8xf32>
    %cst_19 = arith.constant dense<0xFF800000> : vector<8xf32>
    %36 = vector.multi_reduction <maximumf>, %35, %cst_19 [1] : vector<8x8xf32> to vector<8xf32>
    %37 = vector.shape_cast %36 : vector<8xf32> to vector<8x1xf32>
    %38 = vector.broadcast %37 : vector<8x1xf32> to vector<8x8xf32>
    %39 = arith.subf %35, %38 : vector<8x8xf32>
    %40 = math.exp %39 : vector<8x8xf32>
    %cst_20 = arith.constant dense<0.000000e+00> : vector<8xf32>
    %41 = vector.multi_reduction <add>, %40, %cst_20 [1] : vector<8x8xf32> to vector<8xf32>
    %42 = vector.shape_cast %41 : vector<8xf32> to vector<8x1xf32>
    %43 = tpu.reciprocal %42 {approx = true} : vector<8x1xf32> -> vector<8x1xf32>
    %44 = vector.broadcast %43 : vector<8x1xf32> to vector<8x8xf32>
    %45 = arith.mulf %40, %44 : vector<8x8xf32>
    %cst_21 = arith.constant dense<0.000000e+00> : vector<8x32xf32>
    %46 = tpu.matmul %45, %32, %cst_21 {dimension_numbers = #tpu.dot_dimension_numbers<[1], [0], [0], [1], [0, 0, 1, 1], [], []>} : vector<8x8xf32>, vector<8x32xf32>, vector<8x32xf32> -> vector<8x32xf32>
    %c0_22 = arith.constant 0 : index
    %c32_23 = arith.constant 32 : index
    %47 = vector.load %arg8[%c0_22, %c32_23] : memref<8x128xf32, #tpu.memory_space<vmem>>, vector<8x32xf32>
    tpu.vector_store %arg8[%c0_22, %c32_23], %46 {strides = array<i32>} : memref<8x128xf32, #tpu.memory_space<vmem>>, vector<8x32xf32>,
    %48 = vector.extract_strided_slice %9 {offsets = [0, 64], sizes = [8, 32], strides = [1, 1]} : vector<8x128xf32> to vector<8x32xf32>
    %c0_24 = arith.constant 0 : index
    %c64 = arith.constant 64 : index
    %49 = vector.load %arg7[%c0_24, %c64] : memref<8x256xf32, #tpu.memory_space<vmem>>, vector<8x32xf32>
    %c0_25 = arith.constant 0 : index
    %c192 = arith.constant 192 : index
    %50 = vector.load %arg7[%c0_25, %c192] : memref<8x256xf32, #tpu.memory_space<vmem>>, vector<8x32xf32>
    %cst_26 = arith.constant dense<0.000000e+00> : vector<8x8xf32>
    %51 = tpu.matmul %48, %49, %cst_26 {dimension_numbers = #tpu.dot_dimension_numbers<[1], [1], [0], [0], [0, 0, 1, 0], [], []>} : vector<8x32xf32>, vector<8x32xf32>, vector<8x8xf32> -> vector<8x8xf32>
    %52 = vector.broadcast %11 : vector<1x8xf32> to vector<8x8xf32>
    %53 = arith.addf %51, %52 : vector<8x8xf32>
    %cst_27 = arith.constant dense<0xFF800000> : vector<8xf32>
    %54 = vector.multi_reduction <maximumf>, %53, %cst_27 [1] : vector<8x8xf32> to vector<8xf32>
    %55 = vector.shape_cast %54 : vector<8xf32> to vector<8x1xf32>
    %56 = vector.broadcast %55 : vector<8x1xf32> to vector<8x8xf32>
    %57 = arith.subf %53, %56 : vector<8x8xf32>
    %58 = math.exp %57 : vector<8x8xf32>
    %cst_28 = arith.constant dense<0.000000e+00> : vector<8xf32>
    %59 = vector.multi_reduction <add>, %58, %cst_28 [1] : vector<8x8xf32> to vector<8xf32>
    %60 = vector.shape_cast %59 : vector<8xf32> to vector<8x1xf32>
    %61 = tpu.reciprocal %60 {approx = true} : vector<8x1xf32> -> vector<8x1xf32>
    %62 = vector.broadcast %61 : vector<8x1xf32> to vector<8x8xf32>
    %63 = arith.mulf %58, %62 : vector<8x8xf32>
    %cst_29 = arith.constant dense<0.000000e+00> : vector<8x32xf32>
    %64 = tpu.matmul %63, %50, %cst_29 {dimension_numbers = #tpu.dot_dimension_numbers<[1], [0], [0], [1], [0, 0, 1, 1], [], []>} : vector<8x8xf32>, vector<8x32xf32>, vector<8x32xf32> -> vector<8x32xf32>
    %c0_30 = arith.constant 0 : index
    %c64_31 = arith.constant 64 : index
    %65 = vector.load %arg8[%c0_30, %c64_31] : memref<8x128xf32, #tpu.memory_space<vmem>>, vector<8x32xf32>
    tpu.vector_store %arg8[%c0_30, %c64_31], %64 {strides = array<i32>} : memref<8x128xf32, #tpu.memory_space<vmem>>, vector<8x32xf32>,
    %66 = vector.extract_strided_slice %9 {offsets = [0, 96], sizes = [8, 32], strides = [1, 1]} : vector<8x128xf32> to vector<8x32xf32>
    %c0_32 = arith.constant 0 : index
    %c96 = arith.constant 96 : index
    %67 = vector.load %arg7[%c0_32, %c96] : memref<8x256xf32, #tpu.memory_space<vmem>>, vector<8x32xf32>
    %c0_33 = arith.constant 0 : index
    %c224 = arith.constant 224 : index
    %68 = vector.load %arg7[%c0_33, %c224] : memref<8x256xf32, #tpu.memory_space<vmem>>, vector<8x32xf32>
    %cst_34 = arith.constant dense<0.000000e+00> : vector<8x8xf32>
    %69 = tpu.matmul %66, %67, %cst_34 {dimension_numbers = #tpu.dot_dimension_numbers<[1], [1], [0], [0], [0, 0, 1, 0], [], []>} : vector<8x32xf32>, vector<8x32xf32>, vector<8x8xf32> -> vector<8x8xf32>
    %70 = vector.broadcast %11 : vector<1x8xf32> to vector<8x8xf32>
    %71 = arith.addf %69, %70 : vector<8x8xf32>
    %cst_35 = arith.constant dense<0xFF800000> : vector<8xf32>
    %72 = vector.multi_reduction <maximumf>, %71, %cst_35 [1] : vector<8x8xf32> to vector<8xf32>
    %73 = vector.shape_cast %72 : vector<8xf32> to vector<8x1xf32>
    %74 = vector.broadcast %73 : vector<8x1xf32> to vector<8x8xf32>
    %75 = arith.subf %71, %74 : vector<8x8xf32>
    %76 = math.exp %75 : vector<8x8xf32>
    %cst_36 = arith.constant dense<0.000000e+00> : vector<8xf32>
    %77 = vector.multi_reduction <add>, %76, %cst_36 [1] : vector<8x8xf32> to vector<8xf32>
    %78 = vector.shape_cast %77 : vector<8xf32> to vector<8x1xf32>
    %79 = tpu.reciprocal %78 {approx = true} : vector<8x1xf32> -> vector<8x1xf32>
    %80 = vector.broadcast %79 : vector<8x1xf32> to vector<8x8xf32>
    %81 = arith.mulf %76, %80 : vector<8x8xf32>
    %cst_37 = arith.constant dense<0.000000e+00> : vector<8x32xf32>
    %82 = tpu.matmul %81, %68, %cst_37 {dimension_numbers = #tpu.dot_dimension_numbers<[1], [0], [0], [1], [0, 0, 1, 1], [], []>} : vector<8x8xf32>, vector<8x32xf32>, vector<8x32xf32> -> vector<8x32xf32>
    %c0_38 = arith.constant 0 : index
    %c96_39 = arith.constant 96 : index
    %83 = vector.load %arg8[%c0_38, %c96_39] : memref<8x128xf32, #tpu.memory_space<vmem>>, vector<8x32xf32>
    tpu.vector_store %arg8[%c0_38, %c96_39], %82 {strides = array<i32>} : memref<8x128xf32, #tpu.memory_space<vmem>>, vector<8x32xf32>,
    %c0_40 = arith.constant 0 : index
    %c0_41 = arith.constant 0 : index
    %84 = vector.load %arg8[%c0_40, %c0_41] : memref<8x128xf32, #tpu.memory_space<vmem>>, vector<8x128xf32>
    %c0_42 = arith.constant 0 : index
    %c0_43 = arith.constant 0 : index
    %85 = vector.load %arg5[%c0_42, %c0_43] : memref<128x256xf32, #tpu.memory_space<vmem>>, vector<128x256xf32>
    %cst_44 = arith.constant dense<0.000000e+00> : vector<8x256xf32>
    %86 = tpu.matmul %84, %85, %cst_44 {dimension_numbers = #tpu.dot_dimension_numbers<[1], [0], [0], [1], [0, 0, 1, 1], [], []>} : vector<8x128xf32>, vector<128x256xf32>, vector<8x256xf32> -> vector<8x256xf32>
    %c0_45 = arith.constant 0 : index
    %c0_46 = arith.constant 0 : index
    %c0_47 = arith.constant 0 : index
    %87 = vector.load %arg6[%c0_45, %c0_46, %c0_47] : memref<1x8x256xf32, #tpu.memory_space<vmem>>, vector<1x8x256xf32>
    %88 = vector.shape_cast %87 : vector<1x8x256xf32> to vector<8x256xf32>
    %89 = vector.shape_cast %86 : vector<8x256xf32> to vector<1x8x256xf32>
    tpu.vector_store %arg6[%c0_45, %c0_46, %c0_47], %89 {strides = array<i32>} : memref<1x8x256xf32, #tpu.memory_space<vmem>>, vector<1x8x256xf32>,
    return
  }
  func.func @transform_0(%arg0: i32, %arg1: i32) -> (i32, i32, i32) {
    %c0_i32 = arith.constant 0 : i32
    %c0_i32_0 = arith.constant 0 : i32
    %c0_i32_1 = arith.constant 0 : i32
    return %arg0, %c0_i32, %c0_i32_0 : i32, i32, i32
  }
  func.func @transform_1(%arg0: i32, %arg1: i32) -> (i32, i32, i32) {
    %c0_i32 = arith.constant 0 : i32
    %c0_i32_0 = arith.constant 0 : i32
    %c0_i32_1 = arith.constant 0 : i32
    return %arg0, %c0_i32, %c0_i32_0 : i32, i32, i32
  }
  func.func @transform_2(%arg0: i32, %arg1: i32) -> (i32, i32) {
    %c0_i32 = arith.constant 0 : i32
    %c0_i32_0 = arith.constant 0 : i32
    %c0_i32_1 = arith.constant 0 : i32
    return %c0_i32, %c0_i32_0 : i32, i32
  }
  func.func @transform_3(%arg0: i32, %arg1: i32) -> (i32, i32) {
    %c0_i32 = arith.constant 0 : i32
    %c0_i32_0 = arith.constant 0 : i32
    %c0_i32_1 = arith.constant 0 : i32
    return %c0_i32, %c0_i32_0 : i32, i32
  }
  func.func @transform_4(%arg0: i32, %arg1: i32) -> (i32, i32, i32) {
    %c0_i32 = arith.constant 0 : i32
    %c0_i32_0 = arith.constant 0 : i32
    return %arg0, %arg1, %c0_i32 : i32, i32, i32
  }
}

</mosaic_0001>

<bundles_post_ra>
// kernel: tpu_custom_call.1
= control target key start
LH: loop header
LB: loop body
LE: loop exit
PB: predicated region body
PF: predicated region fallthrough
CT: control target
= control target key end

     0   :  { %s1648_s0 = inlined_call_operand.hbm [shape: f32[2,8,256], index: 0, kind: input, shape index: {}]   ;;  %s1649_s1 = inlined_call_operand.hbm [shape: f32[2,1,8], index: 1, kind: input, shape index: {}]   ;;  %s1650_s2 = inlined_call_operand.hbm [shape: f32[256,384], index: 2, kind: input, shape index: {}]   ;;  %s1651_s3 = inlined_call_operand.hbm [shape: f32[128,256], index: 3, kind: input, shape index: {}]   ;;  %s1652_s4 = inlined_call_operand.hbm [shape: f32[2,8,256], index: 4, kind: output, shape index: {}]  }
   0x1   :  { %1655 = sst [smem:[#allocation21_spill]] %s1650_s2 }
   0x2   :  { %1656 = sst [smem:[#allocation22_spill]] %s1651_s3 }
   0x3   :  { %9 = vsyncpa [#allocation5], 0 }
   0x4   :  { %11 = vsyncpa [#allocation5 + $0x1], 0 }
   0x5   :  { %12 = vsyncpa [#allocation8], 0 }
   0x6   :  { %14 = vsyncpa [#allocation8 + $0x1], 0 }
   0x7   :  { %15 = vsyncpa [#allocation11], 0 }
   0x8   :  { %16 = vsyncpa [#allocation6], 0 }
   0x9   :  { %18 = vsyncpa [#allocation6 + $0x1], 0  ;;  %s1434_s15 = smov 0   ;;  %s1436_s16 = smov 0  }
   0xa   :  { %s1438_s17 = smov 0   ;;  %s1440_s18 = smov 0  }
   0xb   :  { %s1442_s19 = smov 0   ;;  %s1444_s20 = smov 0  }
   0xc LB: > { %1657 = sst [smem:[#allocation18_spill]] %s1386_s17  ;;  %s1465_s21 = sadd.s32 4294967295, %s1398_s20   ;;  %s1398_s20 = sphi %s1444_s20, %s24_s20   ;;  %s1394_s19 = sphi %s1442_s19, %s1674_s19   ;;  %s1390_s18 = sphi %s1440_s18, %s1673_s18   ;;  %s1386_s17 = sphi %s1438_s17, %s1672_s17   ;;  %s1382_s16 = sphi %s1436_s16, %s1671_s16   ;;  %s1378_s15 = sphi %s1434_s15, %s1670_s15  }
   0xd   : > { %p1041_p0 = scmp.ge.s32.totalorder %s1398_s20, 1  ;;  %p57_p1 = scmp.eq.s32.totalorder %s1465_s21, 0 }
   0xe   : > { %p163_p2 = scmp.lt.s32.totalorder %s1398_s20, 3  ;;  %s1658_s2 = sld [smem:[#allocation21_spill]] }
   0xf   : > { %s1400_s26 = smov [#allocation9]   ;;  %p1044_p6 = scmp.ge.s32.totalorder %s1398_s20, 2 }
  0x10   : > { %p1473_p3 = pnand %p1041_p0, %p163_p2  ;;  %s176_s27 = sshll.u32 %s1400_s26, 4  ;;  %s177_s27 = int_to_ptr.vmem [resolvable:$true] %s176_s27 }
  0x11   : > { %s1660_s3 = sld [smem:[#allocation22_spill]]  ;;  %s1401_s5 = smov 384  }
  0x12   : > { %p1086_p4 = pneg %p1473_p3  ;;  %s1402_s6 = smov 24  }
  0x13   : > { %s1403_s7 = smov [#allocation10]   ;;  %s1404_s9 = smov 256  }
  0x14   : > { %s174_s24 = sshll.u32 %s1658_s2, 4  ;;  %p1087_p5 = pnand %p1086_p4, %p57_p1  ;;  %s175_s24 = int_to_ptr.hbm [resolvable:$true] %s174_s24 }
  0x15   : > { %s190_s8 = sshll.u32 %s1403_s7, 4  ;;  %s1405_s10 = smov 16   ;;  %s191_s8 = int_to_ptr.vmem [resolvable:$true] %s190_s8 }
  0x16   : > { %1089 = dma.hbm_to_vmem [thread:$0]  (!%p1087_p5), %s175_s24, 12288, %s177_s27, [#allocation8], %s1401_s5, %s1401_s5, %s1402_s6  }
  0x17   : > { %s188_s30 = sshll.u32 %s1660_s3, 4  ;;  %s1040_s11 = sadd.s32 4294967294, %s1398_s20   ;;  %s189_s30 = int_to_ptr.hbm [resolvable:$true] %s188_s30 }
  0x18   : > { %1092 = dma.hbm_to_vmem [thread:$0]  (!%p1087_p5), %s189_s30, 4096, %s191_s8, [#allocation11], %s1404_s9, %s1404_s9, %s1405_s10  }
  0x19   : > { %s36_s12 = sadd.s32 1, %s1394_s19  ;;  %s43_s13 = sadd.s32 1, %s1386_s17 }
  0x1a   : > { %p38_p7 = scmp.ge.s32.totalorder %s36_s12, 2  ;;  %p50_p8 = scmp.ne.s32.totalorder %s1386_s17, %s1382_s16 }
  0x1b   : > { %p51_p9 = scmp.eq.s32.totalorder %s1398_s20, 0  ;;  %p56_p11 = scmp.ne.s32.totalorder %s1382_s16, %s1378_s15 }
  0x1c   : > { %s1676_s12 = smov (%p38_p7, %s36_s12), 0  ;;  %p150_p12 = scmp.eq.s32.totalorder %s1465_s21, 1 }
  0x1d   : > { %1661 = sst [smem:[#allocation19_spill]] %s1676_s12  ;;  %p1493_p10 = por %p51_p9, %p50_p8 }
  0x1e   : > { %s40_s22 = ssub.s32 %s1394_s19, %s1676_s12  ;;  %p1504_p0 = por %p57_p1, %p56_p11 }
  0x1f   : > { %p41_p13 = scmp.eq.s32.totalorder %s40_s22, 0  ;;  %p1508_p2 = por %p150_p12, %p50_p8 }
  0x20   : > { %p156_p4 = scmp.eq.s32.totalorder %s1040_s11, 1  ;;  %p1106_p7 = scmp.lt.s32.totalorder %s1398_s20, 2 }
  0x21   : > { %s1513_s26 = scalar_select %p41_p13, %s1386_s17, %s43_s13  }
  0x22   : > { %p1515_p5 = por %p156_p4, %p56_p11  ;;  %s204_s28 = sand.u32 1, %s1386_s17  }
  0x23   : > { %1665 = sst [smem:[#allocation20_spill]] %s1513_s26  ;;  %s1070_s29 = sshll.u32 %s1394_s19, 4 }
  0x24   : > { %s1045_s30 = sshll.u32 %s204_s28, 4  ;;  %s213_s7 = scalar_lea.hbm %s1648_s0, %s1070_s29 }
  0x25   : > { %s215_s8 = sshll.u32 %s213_s7, 4  ;;  %s208_s9 = scalar_lea.vmem [#allocation4], %s1045_s30  ;;  %s216_s8 = int_to_ptr.hbm [resolvable:$true] %s215_s8 }
  0x26   : > { %s217_s10 = sshll.u32 %s208_s9, 4  ;;  %p1094_p8 = pnand %p1106_p7, %p1493_p10  ;;  %s218_s10 = int_to_ptr.vmem [resolvable:$true] %s217_s10 }
  0x27   : > { %s224_s11 = sand.u32 1, %s1398_s20   ;;  %s230_s2 = scalar_lea.hbm %s1649_s1, %s1394_s19 }
  0x28   : > { %s205_s3 = scalar_lea.sflag [#allocation5], %s204_s28  ;;  %s232_s12 = sshll.u32 %s230_s2, 4  ;;  %s233_s12 = int_to_ptr.hbm [resolvable:$true] %s232_s12 }
  0x29   : > { %1096 = dma.hbm_to_vmem [thread:$0]  (!%p1094_p8), %s216_s8, 256, %s218_s10, %s205_s3  }
  0x2a   : > { %s227_s26 = scalar_lea.vmem [#allocation7], %s204_s28  ;;  %s225_s29 = scalar_lea.sflag [#allocation8], %s224_s11 }
  0x2b   : > { %s234_s17 = sshll.u32 %s227_s26, 4  ;;  %243 = sbr.rel (%p1473_p3) target bundleno = 1147 (0x47b), region = 36  ;;  %s235_s17 = int_to_ptr.vmem [resolvable:$true] %s234_s17 }
  0x2c   : > { %1099 = dma.hbm_to_vmem [thread:$0]  (!%p1094_p8), %s233_s12, 16, %s235_s17, %s225_s29  }
  0x2d   : > { %s1535_s14 = sand.u32 (!%p1473_p3), 1, %s1382_s16  }
  0x2e   : > { %s1049_s30 = sshll.u32 (!%p1473_p3), %s1535_s14, 4  ;;  %s246_s5 = scalar_lea.sflag (!%p1473_p3), [#allocation5], %s1535_s14 }
  0x2f   : > { %s1541_s2 = scalar_lea.vmem (!%p1473_p3), [#allocation4], %s1049_s30 }
  0x30   : > { %1357 = dma.done.wait (%p1504_p0), %s246_s5, 256  }
  0x31   : > { %1359 = vsyncadd (%p1504_p0), %s246_s5, 4294967040  ;;  %s255_s3 = sand.u32 1, %s1465_s21   ;;  %s258_s25 = scalar_lea.vmem [#allocation7], %s1535_s14 }
  0x32   : > { %s256_s17 = scalar_lea.sflag [#allocation8], %s255_s3 }
  0x33   : > { %1361 = dma.done.wait (%p1504_p0), %s256_s17, 16  }
  0x34   : > { %1363 = vsyncadd (%p1504_p0), %s256_s17, 4294967280 }
  0x35   : > { %1365 = dma.done.wait (%p57_p1), [#allocation8], 12288  }
  0x36   : > { %1367 = vsyncadd (%p57_p1), [#allocation8], 4294955008 }
  0x37   : > { %1369 = dma.done.wait (%p57_p1), [#allocation11], 4096  }
  0x38   : > { %1371 = vsyncadd (%p57_p1), [#allocation11], 4294963200  ;;  %v334_v0 = vld [vmem:[#allocation9 + $0x170] sm:$0xff]  ;;  %v332_v2 = vld [vmem:[#allocation9 + $0x158] sm:$0xff]  ;;  %vm536_vm0 = vcmask 261120   ;;  %s1406_s21 = smov 96  }
  0x39   : > { %v366_v1 = vld [vmem:[#allocation9 + $0x2f0] sm:$0xff]  ;;  %368 = vmatpush.msra.mxu0 %v334_v0  ;;  %v364_v3 = vld [vmem:[#allocation9 + $0x2d8] sm:$0xff]  ;;  %v330_v4 = vld [vmem:[#allocation9 + $0x140] sm:$0xff]  ;;  %s1407_s12 = smov 32   ;;  %s1408_s23 = smov 64   ;;  %vm563_vm1 = vcmask 64512  }
  0x3a   : > { %388 = vmatpush.msra.mxu1 %v366_v1  ;;  %v362_v5 = vld [vmem:[#allocation9 + $0x2c0] sm:$0xff]  ;;  %v328_v6 = vld [vmem:[#allocation9 + $0x128] sm:$0xff]  ;;  %v326_v8 = vld [vmem:[#allocation9 + $0x110] sm:$0xff]  ;;  %vm672_vm2 = vcmask 523520   ;;  %vm747_vm3 = vcmask 785920   ;;  %vm822_vm4 = vcmask 1048320  }
  0x3b   : > { %369 = vmatpush.msra.mxu0 %v332_v2  ;;  %v360_v7 = vld [vmem:[#allocation9 + $0x2a8] sm:$0xff]  ;;  %v358_v9 = vld [vmem:[#allocation9 + $0x290] sm:$0xff]  ;;  %v324_v10 = vld [vmem:[#allocation9 + $0xf8] sm:$0xff]  ;;  %s1071_s26 = sshll.u32 %s1390_s18, 4  ;;  %s297_s8 = scalar_lea.vmem [#allocation12], %s1049_s30 }
  0x3c   : > { %389 = vmatpush.msra.mxu1 %v364_v3  ;;  %v356_v11 = vld [vmem:[#allocation9 + $0x278] sm:$0xff]  ;;  %v322_v12 = vld [vmem:[#allocation9 + $0xe0] sm:$0xff]  ;;  %v320_v14 = vld [vmem:[#allocation9 + $0xc8] sm:$0xff]  ;;  %s913_s7 = scalar_lea.hbm %s1652_s4, %s1071_s26  ;;  %s915_s9 = sshll.u32 %s297_s8, 4  ;;  %s916_s9 = int_to_ptr.vmem [resolvable:$true] %s915_s9 }
  0x3d   : > { %370 = vmatpush.msra.mxu0 %v330_v4  ;;  %v354_v13 = vld [vmem:[#allocation9 + $0x260] sm:$0xff]  ;;  %v352_v15 = vld [vmem:[#allocation9 + $0x248] sm:$0xff]  ;;  %v318_v16 = vld [vmem:[#allocation9 + $0xb0] sm:$0xff]  ;;  %s917_s10 = sshll.u32 %s913_s7, 4  ;;  %s900_s11 = scalar_lea.sflag [#allocation6], %s1535_s14  ;;  %s918_s10 = int_to_ptr.hbm [resolvable:$true] %s917_s10 }
  0x3e   : > { %390 = vmatpush.msra.mxu1 %v362_v5  ;;  %v350_v17 = vld [vmem:[#allocation9 + $0x230] sm:$0xff]  ;;  %v316_v18 = vld [vmem:[#allocation9 + $0x98] sm:$0xff]  ;;  %v314_v20 = vld [vmem:[#allocation9 + $0x80] sm:$0xff]  ;;  %s1318_s13 = sshra.s32 %s918_s10, 4  ;;  %s1324_s30 = scalar_lea.hbm %s1652_s4, 32  ;;  %s1319_s13 = int_to_ptr.hbm [resolvable:$true] %s1318_s13 }
  0x3f   : > { %371 = vmatpush.msra.mxu0 %v328_v6  ;;  %v348_v19 = vld [vmem:[#allocation9 + $0x218] sm:$0xff]  ;;  %v346_v21 = vld [vmem:[#allocation9 + $0x200] sm:$0xff]  ;;  %v312_v22 = vld [vmem:[#allocation9 + $0x68] sm:$0xff]  ;;  %s1320_s22 = scalar_lea.hbm %s1319_s13, 16  ;;  %p1325_p10 = scmp.lt.s32.totalorder %s1319_s13, %s1652_s4 }
  0x40   : > { %391 = vmatpush.msra.mxu1 %v360_v7  ;;  %v344_v23 = vld [vmem:[#allocation9 + $0x1e8] sm:$0xff]  ;;  %v310_v24 = vld [vmem:[#allocation9 + $0x50] sm:$0xff]  ;;  %v308_v26 = vld [vmem:[#allocation9 + $0x38] sm:$0xff]  ;;  %p1321_p1 = scmp.ne.s32.totalorder %s1319_s13, %s1320_s22  ;;  %p1326_p11 = scmp.lt.s32.totalorder %s1324_s30, %s1320_s22 }
  0x41   : > { %372 = vmatpush.msra.mxu0 %v326_v8  ;;  %v342_v25 = vld [vmem:[#allocation9 + $0x1d0] sm:$0xff]  ;;  %v340_v27 = vld [vmem:[#allocation9 + $0x1b8] sm:$0xff]  ;;  %v306_v28 = vld [vmem:[#allocation9 + $0x20] sm:$0xff] }
  0x42   : > { %392 = vmatpush.msra.mxu1 %v358_v9  ;;  %v338_v29 = vld [vmem:[#allocation9 + $0x1a0] sm:$0xff]  ;;  %v304_v30 = vld [vmem:[#allocation9 + $0x8] sm:$0xff]  ;;  %v472_v36 = vld [vmem:[#allocation9 + $0x150] sm:$0xff]  ;;  %p1322_p3 = pnand %p1321_p1, %p1508_p2  ;;  %p1327_p12 = por %p1326_p11, %p1325_p10 }
  0x43   : > { %373 = vmatpush.msra.mxu0 %v324_v10  ;;  %v336_v31 = vld [vmem:[#allocation9 + $0x188] sm:$0xff]  ;;  %v488_v37 = vld [vmem:[#allocation9 + $0x2d0] sm:$0xff]  ;;  %v335_v38 = vld [vmem:[#allocation9 + $0x178] sm:$0xff] }
  0x44   : > { %393 = vmatpush.msra.mxu1 %v356_v11  ;;  %v473_v32 = vld [vmem:[#allocation9 + $0x168] sm:$0xff]  ;;  %v471_v39 = vld [vmem:[#allocation9 + $0x138] sm:$0xff]  ;;  %v333_v41 = vld [vmem:[#allocation9 + $0x160] sm:$0xff]  ;;  %408 = vmatpush.msra.mxu2 %v335_v38  ;;  %p1323_p9 = pneg %p1322_p3 }
  0x45   : > { %374 = vmatpush.msra.mxu0 %v322_v12  ;;  %v489_v33 = vld [vmem:[#allocation9 + $0x2e8] sm:$0xff]  ;;  %v487_v40 = vld [vmem:[#allocation9 + $0x2b8] sm:$0xff]  ;;  %v470_v42 = vld [vmem:[#allocation9 + $0x120] sm:$0xff] }
  0x46   : > { %394 = vmatpush.msra.mxu1 %v354_v13  ;;  %v1562_v34 = vld [vmem:[%s1541_s2] sm:$0xff]  ;;  %v1565_v35 = vld [vmem:[%s1541_s2 + $0x8] sm:$0xff]  ;;  %409 = vmatpush.msra.mxu2 %v333_v41  ;;  %p1328_p13 = pnand %p1327_p12, %p1323_p9 }
  0x47   : > { %375 = vmatpush.msra.mxu0 %v320_v14  ;;  %v486_v43 = vld [vmem:[#allocation9 + $0x2a0] sm:$0xff]  ;;  %v331_v44 = vld [vmem:[#allocation9 + $0x148] sm:$0xff]  ;;  %v329_v47 = vld [vmem:[#allocation9 + $0x130] sm:$0xff] }
  0x48   : > { %395 = vmatpush.msra.mxu1 %v352_v15  ;;  %v469_v45 = vld [vmem:[#allocation9 + $0x108] sm:$0xff]  ;;  %v468_v48 = vld [vmem:[#allocation9 + $0xf0] sm:$0xff]  ;;  %410 = vmatpush.msra.mxu2 %v331_v44  ;;  %v327_v50 = vld [vmem:[#allocation9 + $0x118] sm:$0xff] }
  0x49   : > { %376 = vmatpush.msra.mxu0 %v318_v16  ;;  %v485_v46 = vld [vmem:[#allocation9 + $0x288] sm:$0xff]  ;;  %v484_v49 = vld [vmem:[#allocation9 + $0x270] sm:$0xff]  ;;  %v467_v51 = vld [vmem:[#allocation9 + $0xd8] sm:$0xff] }
  0x4a   : > { %396 = vmatpush.msra.mxu1 %v350_v17  ;;  %v483_v52 = vld [vmem:[#allocation9 + $0x258] sm:$0xff]  ;;  %411 = vmatpush.msra.mxu2 %v329_v47  ;;  %v325_v53 = vld [vmem:[#allocation9 + $0x100] sm:$0xff]  ;;  %v323_v56 = vld [vmem:[#allocation9 + $0xe8] sm:$0xff] }
  0x4b   : > { %377 = vmatpush.msra.mxu0 %v316_v18  ;;  %v466_v54 = vld [vmem:[#allocation9 + $0xc0] sm:$0xff]  ;;  %v465_v57 = vld [vmem:[#allocation9 + $0xa8] sm:$0xff]  ;;  %v321_v59 = vld [vmem:[#allocation9 + $0xd0] sm:$0xff] }
  0x4c   : > { %397 = vmatpush.msra.mxu1 %v348_v19  ;;  %v482_v55 = vld [vmem:[#allocation9 + $0x240] sm:$0xff]  ;;  %412 = vmatpush.msra.mxu2 %v327_v50  ;;  %v481_v58 = vld [vmem:[#allocation9 + $0x228] sm:$0xff]  ;;  %v464_v60 = vld [vmem:[#allocation9 + $0x90] sm:$0xff] }
  0x4d   : > { %378 = vmatpush.msra.mxu0 %v314_v20  ;;  %v480_v61 = vld [vmem:[#allocation9 + $0x210] sm:$0xff]  ;;  %v319_v62 = vld [vmem:[#allocation9 + $0xb8] sm:$0xff]  ;;  %v317_v1 = vld [vmem:[#allocation9 + $0xa0] sm:$0xff] }
  0x4e   : > { %398 = vmatpush.msra.mxu1 %v346_v21  ;;  %413 = vmatpush.msra.mxu2 %v325_v53  ;;  %v463_v63 = vld [vmem:[#allocation9 + $0x78] sm:$0xff]  ;;  %v462_v2 = vld [vmem:[#allocation9 + $0x60] sm:$0xff]  ;;  %v315_v4 = vld [vmem:[#allocation9 + $0x88] sm:$0xff] }
  0x4f   : > { %379 = vmatpush.msra.mxu0 %v312_v22  ;;  %v479_v0 = vld [vmem:[#allocation9 + $0x1f8] sm:$0xff]  ;;  %v478_v3 = vld [vmem:[#allocation9 + $0x1e0] sm:$0xff]  ;;  %v461_v5 = vld [vmem:[#allocation9 + $0x48] sm:$0xff] }
  0x50   : > { %399 = vmatpush.msra.mxu1 %v344_v23  ;;  %414 = vmatpush.msra.mxu2 %v323_v56  ;;  %v477_v6 = vld [vmem:[#allocation9 + $0x1c8] sm:$0xff]  ;;  %v313_v7 = vld [vmem:[#allocation9 + $0x70] sm:$0xff]  ;;  %v311_v10 = vld [vmem:[#allocation9 + $0x58] sm:$0xff] }
  0x51   : > { %380 = vmatpush.msra.mxu0 %v310_v24  ;;  %v460_v8 = vld [vmem:[#allocation9 + $0x30] sm:$0xff]  ;;  %v459_v11 = vld [vmem:[#allocation9 + $0x18] sm:$0xff]  ;;  %v309_v13 = vld [vmem:[#allocation9 + $0x40] sm:$0xff] }
  0x52   : > { %400 = vmatpush.msra.mxu1 %v342_v25  ;;  %415 = vmatpush.msra.mxu2 %v321_v59  ;;  %v476_v9 = vld [vmem:[#allocation9 + $0x1b0] sm:$0xff]  ;;  %v475_v12 = vld [vmem:[#allocation9 + $0x198] sm:$0xff]  ;;  %v458_v14 = vld [vmem:[#allocation9] sm:$0xff] }
  0x53   : > { %381 = vmatpush.msra.mxu0 %v308_v26  ;;  %v474_v15 = vld [vmem:[#allocation9 + $0x180] sm:$0xff]  ;;  %v307_v16 = vld [vmem:[#allocation9 + $0x28] sm:$0xff]  ;;  %v305_v17 = vld [vmem:[#allocation9 + $0x10] sm:$0xff] }
  0x54   : > { %401 = vmatpush.msra.mxu1 %v340_v27  ;;  %416 = vmatpush.msra.mxu2 %v319_v62  ;;  %v367_v21 = vld [vmem:[#allocation9 + $0x2f8] sm:$0xff]  ;;  %v365_v22 = vld [vmem:[#allocation9 + $0x2e0] sm:$0xff]  ;;  %v363_v23 = vld [vmem:[#allocation9 + $0x2c8] sm:$0xff] }
  0x55   : > { %382 = vmatpush.msra.mxu0 %v306_v28  ;;  %428 = vmatpush.msra.mxu3 %v367_v21  ;;  %v361_v24 = vld [vmem:[#allocation9 + $0x2b0] sm:$0xff]  ;;  %v359_v25 = vld [vmem:[#allocation9 + $0x298] sm:$0xff]  ;;  %v357_v26 = vld [vmem:[#allocation9 + $0x280] sm:$0xff] }
  0x56   : > { %402 = vmatpush.msra.mxu1 %v338_v29  ;;  %417 = vmatpush.msra.mxu2 %v317_v1  ;;  %v355_v27 = vld [vmem:[#allocation9 + $0x268] sm:$0xff]  ;;  %v353_v28 = vld [vmem:[#allocation9 + $0x250] sm:$0xff]  ;;  %v351_v29 = vld [vmem:[#allocation9 + $0x238] sm:$0xff] }
  0x57   : > { %383 = vmatpush.msra.mxu0 %v304_v30  ;;  %429 = vmatpush.msra.mxu3 %v365_v22  ;;  %v341_v38 = vld [vmem:[#allocation9 + $0x1c0] sm:$0xff]  ;;  %v1167_v47 = vld [vmem:[%s258_s25] ss:$0 sm:$0xff] }
  0x58   : > { %403 = vmatpush.msra.mxu1 %v336_v31  ;;  %384 = vmatmul.f32.vlgmr.msra.gmra.mxu0 %v1562_v34 }
  0x59   : > { %490 = vmatpush.msrb.mxu0 %v473_v32  ;;  %404 = vmatmul.f32.vlgmr.msra.gmra.mxu1 %v1565_v35 }
  0x5a   : > { %510 = vmatpush.msrb.mxu1 %v489_v33  ;;  %418 = vmatpush.msra.mxu2 %v315_v4  ;;  %v349_v33 = vld [vmem:[#allocation9 + $0x220] sm:$0xff] }
  0x5b   : > { %491 = vmatpush.msrb.mxu0 %v472_v36  ;;  %430 = vmatpush.msra.mxu3 %v363_v23  ;;  %v345_v36 = vld [vmem:[#allocation9 + $0x1f0] sm:$0xff] }
  0x5c   : > { %511 = vmatpush.msrb.mxu1 %v488_v37  ;;  %419 = vmatpush.msra.mxu2 %v313_v7  ;;  %v343_v37 = vld [vmem:[#allocation9 + $0x1d8] sm:$0xff] }
  0x5d   : > { %492 = vmatpush.msrb.mxu0 %v471_v39  ;;  %431 = vmatpush.msra.mxu3 %v361_v24  ;;  %v339_v39 = vld [vmem:[#allocation9 + $0x1a8] sm:$0xff] }
  0x5e   : > { %512 = vmatpush.msrb.mxu1 %v487_v40  ;;  %420 = vmatpush.msra.mxu2 %v311_v10  ;;  %v337_v40 = vld [vmem:[#allocation9 + $0x190] sm:$0xff] }
  0x5f   : > { %493 = vmatpush.msrb.mxu0 %v470_v42  ;;  %432 = vmatpush.msra.mxu3 %v359_v25 }
  0x60   : > { %513 = vmatpush.msrb.mxu1 %v486_v43  ;;  %421 = vmatpush.msra.mxu2 %v309_v13 }
  0x61   : > { %494 = vmatpush.msrb.mxu0 %v469_v45  ;;  %433 = vmatpush.msra.mxu3 %v357_v26 }
  0x62   : > { %514 = vmatpush.msrb.mxu1 %v485_v46  ;;  %422 = vmatpush.msra.mxu2 %v307_v16 }
  0x63   : > { %495 = vmatpush.msrb.mxu0 %v468_v48  ;;  %434 = vmatpush.msra.mxu3 %v355_v27 }
  0x64   : > { %515 = vmatpush.msrb.mxu1 %v484_v49  ;;  %423 = vmatpush.msra.mxu2 %v305_v17 }
  0x65   : > { %496 = vmatpush.msrb.mxu0 %v467_v51  ;;  %424 = vmatmul.f32.vlgmr.msra.gmra.mxu2 %v1562_v34 }
  0x66   : > { %516 = vmatpush.msrb.mxu1 %v483_v52  ;;  %435 = vmatpush.msra.mxu3 %v353_v28 }
  0x67   : > { %497 = vmatpush.msrb.mxu0 %v466_v54 }
  0x68   : > { %517 = vmatpush.msrb.mxu1 %v482_v55  ;;  %436 = vmatpush.msra.mxu3 %v351_v29 }
  0x69   : > { %498 = vmatpush.msrb.mxu0 %v465_v57 }
  0x6a   : > { %518 = vmatpush.msrb.mxu1 %v481_v58  ;;  %437 = vmatpush.msra.mxu3 %v349_v33 }
  0x6b   : > { %499 = vmatpush.msrb.mxu0 %v464_v60 }
  0x6c   : > { %519 = vmatpush.msrb.mxu1 %v480_v61 }
  0x6d   : > { %500 = vmatpush.msrb.mxu0 %v463_v63 }
  0x6e   : > { %520 = vmatpush.msrb.mxu1 %v479_v0 }
  0x6f   : > { %501 = vmatpush.msrb.mxu0 %v462_v2 }
  0x70   : > { %521 = vmatpush.msrb.mxu1 %v478_v3 }
  0x71   : > { %502 = vmatpush.msrb.mxu0 %v461_v5 }
  0x72   : > { %522 = vmatpush.msrb.mxu1 %v477_v6 }
  0x73   : > { %503 = vmatpush.msrb.mxu0 %v460_v8 }
  0x74   : > { %523 = vmatpush.msrb.mxu1 %v476_v9 }
  0x75   : > { %504 = vmatpush.msrb.mxu0 %v459_v11 }
  0x76   : > { %524 = vmatpush.msrb.mxu1 %v475_v12 }
  0x77   : > { %505 = vmatpush.msrb.mxu0 %v458_v14 }
  0x78   : > { %525 = vmatpush.msrb.mxu1 %v474_v15  ;;  %506 = vmatmul.f32.vlgmr.msrb.gmra.mxu0 %v1562_v34  ;;  %v347_v34 = vld [vmem:[#allocation9 + $0x208] sm:$0xff] }
  0x79   : > { %526 = vmatmul.f32.vlgmr.msrb.gmra.mxu1 %v1565_v35  ;;  %438 = vmatpush.msra.mxu3 %v347_v34 }
  0x7b   : > { %439 = vmatpush.msra.mxu3 %v345_v36  ;;  %v855_v36 = vld [vmem:[#allocation10 + $0xf0] sm:$0xff] }
  0x7c   : > { %857 = vmatpush.msra.mxu0 %v855_v36 }
  0x7d   : > { %440 = vmatpush.msra.mxu3 %v343_v37  ;;  %v856_v37 = vld [vmem:[#allocation10 + $0xf8] sm:$0xff] }
  0x7e   : > { %877 = vmatpush.msra.mxu1 %v856_v37 }
  0x7f   : > { %441 = vmatpush.msra.mxu3 %v341_v38  ;;  %v853_v38 = vld [vmem:[#allocation10 + $0xe0] sm:$0xff] }
  0x80   : > { %858 = vmatpush.msra.mxu0 %v853_v38 }
  0x81   : > { %442 = vmatpush.msra.mxu3 %v339_v39  ;;  %v854_v39 = vld [vmem:[#allocation10 + $0xe8] sm:$0xff] }
  0x82   : > { %878 = vmatpush.msra.mxu1 %v854_v39 }
  0x83   : > { %443 = vmatpush.msra.mxu3 %v337_v40  ;;  %v851_v40 = vld [vmem:[#allocation10 + $0xd0] sm:$0xff] }
  0x84   : > { %444 = vmatmul.f32.vlgmr.msra.gmra.mxu3 %v1565_v35  ;;  %859 = vmatpush.msra.mxu0 %v851_v40 }
  0xd5   : > { %v385_v18 = vpop.f32.mrf.mxu0 }
  0xd6   : > { %v405_v19 = vpop.f32.mrf.mxu1 }
  0xd7   : > { %v406_v20 = vadd.f32 %v405_v19, %v385_v18 }
  0xd9   : > { %604 = vrot.lane.b32.xlu0 %v406_v20, %s1406_s21  ;;  %754 = vrot.lane.b32.xlu2 %v406_v20, %s1407_s12 }
  0xda   : > { %679 = vrot.lane.b32.xlu1 %v406_v20, %s1408_s23  ;;  %1053 = vmatpush.xpose.msk.msrb.mxu2 %vm536_vm0, %v406_v20 }
  0xe8   : > { %v425_v45 = vpop.f32.mrf.mxu2 }
  0xf5   : > { %v507_v30 = vpop.f32.mrf.mxu0 }
  0xf6   : > { %v527_v31 = vpop.f32.mrf.mxu1 }
  0xf7   : > { %v528_v32 = vadd.f32 %v527_v31, %v507_v30 }
  0xf9   : > { %751 = vrot.lane.b32.xlu2 %v528_v32, %s1407_s12  ;;  %676 = vrot.lane.b32.xlu1 %v528_v32, %s1408_s23 }
  0xfa   : > { %601 = vrot.lane.b32.xlu0 %v528_v32, %s1406_s21  ;;  %1054 = vmatmul.msk.f32.vlgmr.msrb.gmra.mxu2 %vm536_vm0, %v528_v32 }
 0x107   : > { %v445_v51 = vpop.f32.mrf.mxu3 }
 0x108   : > { %v446_v52 = vadd.f32 %v445_v51, %v425_v45  ;;  %v848_v45 = vld [vmem:[#allocation10 + $0xb8] sm:$0xff]  ;;  %v841_v51 = vld [vmem:[#allocation10 + $0x80] sm:$0xff] }
 0x10a   : > { %593 = vmatpush.msrb.mxu3 %v446_v52 }
 0x133   : > { %v755_v44 = vpop.permute.xlu2 %754 }
 0x14b   : > { %v605_v41 = vpop.permute.xlu0 %604 }
 0x14c   : > { %v680_v42 = vpop.permute.xlu1 %679  ;;  %1056 = vmatpush.xpose.msk.msra.mxu2 %vm536_vm0, %v605_v41  ;;  %v852_v41 = vld [vmem:[#allocation10 + $0xd8] sm:$0xff] }
 0x14d   : > { %879 = vmatpush.msra.mxu1 %v852_v41 }
 0x150   : > { %1059 = vmatpush.xpose.msk.msrb.mxu2 %vm536_vm0, %v680_v42  ;;  %v849_v42 = vld [vmem:[#allocation10 + $0xc0] sm:$0xff] }
 0x151   : > { %860 = vmatpush.msra.mxu0 %v849_v42 }
 0x153   : > { %v752_v48 = vpop.permute.xlu2 %751 }
 0x16b   : > { %v677_v46 = vpop.permute.xlu1 %676 }
 0x16c   : > { %v602_v43 = vpop.permute.xlu0 %601 }
 0x16d   : > { %1057 = vmatmul.msk.f32.vlgmr.msra.gmra.mxu2 %vm536_vm0, %v602_v43  ;;  %v850_v43 = vld [vmem:[#allocation10 + $0xc8] sm:$0xff] }
 0x16e   : > { %1062 = vmatpush.xpose.msk.msra.mxu2 %vm536_vm0, %v755_v44  ;;  %v847_v44 = vld [vmem:[#allocation10 + $0xb0] sm:$0xff]  ;;  %880 = vmatpush.msra.mxu1 %v850_v43 }
 0x16f   : > { %861 = vmatpush.msra.mxu0 %v847_v44 }
 0x170   : > { %881 = vmatpush.msra.mxu1 %v848_v45 }
 0x175   : > { %1060 = vmatmul.msk.f32.vlgmr.msrb.gmra.mxu2 %vm536_vm0, %v677_v46 }
 0x17d   : > { %v560_v35 = vpop.f32.mrf.mxu2  ;;  %1063 = vmatmul.msk.f32.vlgmr.msra.gmra.mxu2 %vm536_vm0, %v752_v48  ;;  %v846_v48 = vld [vmem:[#allocation10 + $0xa8] sm:$0xff] }
 0x17e   : > { %v561_v49 = vadd.f32 %v1167_v47, %v560_v35  ;;  %v843_v35 = vld [vmem:[#allocation10 + $0x90] sm:$0xff]  ;;  %882 = vmatpush.msra.mxu1 %v846_v48 }
 0x180   : > { %v564_v50 = vsel %vm563_vm1, %v561_v49, -inf }
 0x181   : > { %565 = vmax.xlane.f32.xlu0 %v564_v50 }
 0x1f0   : > { %v627_v53 = vpop.f32.mrf.mxu2 }
 0x1f1   : > { %v628_v54 = vadd.f32 %v1167_v47, %v627_v53  ;;  %v839_v53 = vld [vmem:[#allocation10 + $0x70] sm:$0xff] }
 0x1f3   : > { %v630_v55 = vsel %vm563_vm1, %v628_v54, -inf }
 0x1f4   : > { %631 = vmax.xlane.f32.xlu1 %v630_v55  ;;  %v566_v56 = vpop.xlane.xlu0 %565  ;;  %v837_v55 = vld [vmem:[#allocation10 + $0x60] sm:$0xff] }
 0x1f5   : > { %v567_v57 = vsub.f32 %v561_v49, %v566_v56  ;;  %v844_v49 = vld [vmem:[#allocation10 + $0x98] sm:$0xff]  ;;  %v838_v56 = vld [vmem:[#allocation10 + $0x68] sm:$0xff] }
 0x1f6   : > { %883 = vmatpush.msra.mxu1 %v844_v49 }
 0x1f7   : > { %v568_v58 = vmul.f32 1.442695, %v567_v57  ;;  %v835_v57 = vld [vmem:[#allocation10 + $0x50] sm:$0xff] }
 0x1f8   : > { %v702_v59 = vpop.f32.mrf.mxu2 }
 0x1f9   : > { %1168 = vpow2.f32 %v568_v58  ;;  %v703_v60 = vadd.f32 %v1167_v47, %v702_v59  ;;  %v836_v58 = vld [vmem:[#allocation10 + $0x58] sm:$0xff]  ;;  %v833_v59 = vld [vmem:[#allocation10 + $0x40] sm:$0xff] }
 0x1fb   : > { %v705_v61 = vsel %vm563_vm1, %v703_v60, -inf }
 0x1fc   : > { %706 = vmax.xlane.f32.xlu2 %v705_v61  ;;  %v831_v61 = vld [vmem:[#allocation10 + $0x30] sm:$0xff] }
 0x1ff   : > { %v1169_v62 = vpop.eup %1168 }
 0x200   : > { %v777_v63 = vpop.f32.mrf.mxu2  ;;  %v570_v0 = vsel %vm563_vm1, %v1169_v62, 0.0 }
 0x201   : > { %v778_v1 = vadd.f32 %v1167_v47, %v777_v63  ;;  %571 = vadd.xlane.f32.xlu0 %v570_v0  ;;  %v845_v47 = vld [vmem:[#allocation10 + $0xa0] sm:$0xff]  ;;  %v830_v0 = vld [vmem:[#allocation10 + $0x28] sm:$0xff] }
 0x202   : > { %862 = vmatpush.msra.mxu0 %v845_v47  ;;  %v829_v63 = vld [vmem:[#allocation10 + $0x20] sm:$0xff] }
 0x203   : > { %v780_v2 = vsel %vm563_vm1, %v778_v1, -inf }
 0x204   : > { %781 = vmax.xlane.f32.xlu2 %v780_v2  ;;  %863 = vmatpush.msra.mxu0 %v843_v35  ;;  %v828_v2 = vld [vmem:[#allocation10 + $0x18] sm:$0xff] }
 0x206   : > { %864 = vmatpush.msra.mxu0 %v841_v51 }
 0x208   : > { %865 = vmatpush.msra.mxu0 %v839_v53 }
 0x20a   : > { %866 = vmatpush.msra.mxu0 %v837_v55 }
 0x20c   : > { %867 = vmatpush.msra.mxu0 %v835_v57 }
 0x20e   : > { %868 = vmatpush.msra.mxu0 %v833_v59 }
 0x210   : > { %869 = vmatpush.msra.mxu0 %v831_v61 }
 0x212   : > { %870 = vmatpush.msra.mxu0 %v829_v63 }
 0x215   : > { %642 = vrot.lane.b32.xlu0 %v446_v52, %s1406_s21 }
 0x267   : > { %v632_v3 = vpop.xlane.xlu1 %631 }
 0x268   : > { %v633_v4 = vsub.f32 %v628_v54, %v632_v3  ;;  %v840_v54 = vld [vmem:[#allocation10 + $0x78] sm:$0xff]  ;;  %v825_v3 = vld [vmem:[#allocation10] sm:$0xff] }
 0x26a   : > { %v634_v5 = vmul.f32 1.442695, %v633_v4  ;;  %v826_v4 = vld [vmem:[#allocation10 + $0x8] sm:$0xff] }
 0x26c   : > { %1170 = vpow2.f32 %v634_v5 }
 0x26f   : > { %v707_v6 = vpop.xlane.xlu2 %706 }
 0x270   : > { %v708_v7 = vsub.f32 %v703_v60, %v707_v6  ;;  %v834_v60 = vld [vmem:[#allocation10 + $0x48] sm:$0xff] }
 0x272   : > { %v1171_v8 = vpop.eup %1170  ;;  %v709_v9 = vmul.f32 1.442695, %v708_v7 }
 0x273   : > { %v636_v10 = vsel %vm563_vm1, %v1171_v8, 0.0 }
 0x274   : > { %1172 = vpow2.f32 %v709_v9  ;;  %637 = vadd.xlane.f32.xlu1 %v636_v10  ;;  %v572_v11 = vpop.xlane.xlu0 %571 }
 0x275   : > { %1174 = vrcp.f32 %v572_v11 }
 0x277   : > { %v782_v12 = vpop.xlane.xlu2 %781 }
 0x278   : > { %v783_v13 = vsub.f32 %v778_v1, %v782_v12  ;;  %v827_v1 = vld [vmem:[#allocation10 + $0x10] sm:$0xff] }
 0x279   : > { %871 = vmatpush.msra.mxu0 %v827_v1 }
 0x27a   : > { %v1173_v14 = vpop.eup %1172  ;;  %v784_v15 = vmul.f32 1.442695, %v783_v13 }
 0x27b   : > { %v1175_v16 = vpop.eup %1174  ;;  %v711_v17 = vsel %vm563_vm1, %v1173_v14, 0.0  ;;  %872 = vmatpush.msra.mxu0 %v825_v3 }
 0x27c   : > { %1176 = vpow2.f32 %v784_v15  ;;  %712 = vadd.xlane.f32.xlu2 %v711_v17  ;;  %v574_v18 = vmul.f32 %v1175_v16, %v1169_v62  ;;  %v832_v62 = vld [vmem:[#allocation10 + $0x38] sm:$0xff] }
 0x27e   : > { %1055 = vmatmul.msk.f32.vlgmr.msrb.gmra.mxu3 %vm563_vm1, %v574_v18 }
 0x282   : > { %v1177_v19 = vpop.eup %1176 }
 0x283   : > { %v786_v20 = vsel %vm563_vm1, %v1177_v19, 0.0 }
 0x284   : > { %787 = vadd.xlane.f32.xlu1 %v786_v20 }
 0x287   : > { %v643_v21 = vpop.permute.xlu0 %642 }
 0x288   : > { %663 = vmatpush.msra.mxu3 %v643_v21 }
 0x294   : > { %717 = vrot.lane.b32.xlu2 %v446_v52, %s1408_s23 }
 0x29d   : > { %792 = vrot.lane.b32.xlu1 %v446_v52, %s1407_s12  ;;  %v842_v52 = vld [vmem:[#allocation10 + $0x88] sm:$0xff] }
 0x29e   : > { %884 = vmatpush.msra.mxu1 %v842_v52 }
 0x2a0   : > { %885 = vmatpush.msra.mxu1 %v840_v54 }
 0x2a2   : > { %886 = vmatpush.msra.mxu1 %v838_v56 }
 0x2a4   : > { %887 = vmatpush.msra.mxu1 %v836_v58 }
 0x2a6   : > { %888 = vmatpush.msra.mxu1 %v834_v60 }
 0x2a8   : > { %889 = vmatpush.msra.mxu1 %v832_v62 }
 0x2aa   : > { %890 = vmatpush.msra.mxu1 %v830_v0 }
 0x2ac   : > { %891 = vmatpush.msra.mxu1 %v828_v2 }
 0x2ae   : > { %892 = vmatpush.msra.mxu1 %v826_v4 }
 0x2e7   : > { %v638_v22 = vpop.xlane.xlu1 %637 }
 0x2e8   : > { %1178 = vrcp.f32 %v638_v22 }
 0x2ee   : > { %v1179_v23 = vpop.eup %1178 }
 0x2ef   : > { %v640_v24 = vmul.f32 %v1179_v23, %v1171_v8  ;;  %v713_v25 = vpop.xlane.xlu2 %712 }
 0x2f0   : > { %1180 = vrcp.f32 %v713_v25 }
 0x2f1   : > { %1058 = vmatmul.msk.f32.vlgmr.msra.gmra.mxu3 %vm563_vm1, %v640_v24 }
 0x2f6   : > { %v1181_v26 = vpop.eup %1180 }
 0x2f7   : > { %v715_v27 = vmul.f32 %v1181_v26, %v1173_v14  ;;  %v718_v28 = vpop.permute.xlu2 %717  ;;  %v788_v30 = vpop.xlane.xlu1 %787 }
 0x2f8   : > { %738 = vmatpush.msrb.mxu3 %v718_v28  ;;  %1182 = vrcp.f32 %v788_v30 }
 0x2f9   : > { %1061 = vmatmul.msk.f32.vlgmr.msrb.gmra.mxu3 %vm563_vm1, %v715_v27 }
 0x2fe   : > { %v1183_v31 = vpop.eup %1182 }
 0x2ff   : > { %v790_v32 = vmul.f32 %v1183_v31, %v1177_v19 }
 0x301   : > { %v595_v29 = vpop.f32.mrf.mxu3 }
 0x302   : > { %598 = vst.msk [vmem:[#allocation3] sm:$0xff] %vm536_vm0, %v595_v29 }
 0x30f   : > { %v793_v33 = vpop.permute.xlu1 %792 }
 0x310   : > { %813 = vmatpush.msra.mxu3 %v793_v33 }
 0x311   : > { %1064 = vmatmul.msk.f32.vlgmr.msra.gmra.mxu3 %vm563_vm1, %v790_v32 }
 0x374   : > { %v665_v34 = vpop.f32.mrf.mxu3 }
 0x375   : > { %669 = vrot.lane.b32.xlu0 %v665_v34, %s1407_s12 }
 0x37c   : > { %v740_v46 = vpop.f32.mrf.mxu3 }
 0x37d   : > { %744 = vrot.lane.b32.xlu0 %v740_v46, %s1408_s23 }
 0x394   : > { %v815_v50 = vpop.f32.mrf.mxu3 }
 0x395   : > { %819 = vrot.lane.b32.xlu2 %v815_v50, %s1406_s21 }
 0x3e7   : > { %v670_v5 = vpop.permute.xlu0 %669 }
 0x3e8   : > { %673 = vst.msk [vmem:[#allocation3] sm:$0xff] %vm672_vm2, %v670_v5 }
 0x3ef   : > { %v745_v6 = vpop.permute.xlu0 %744  ;;  %v820_v7 = vpop.permute.xlu2 %819 }
 0x3f0   : > { %748 = vst.msk [vmem:[#allocation3] sm:$0xff] %vm747_vm3, %v745_v6 }
 0x3f1   : > { %823 = vst.msk [vmem:[#allocation3] sm:$0xff] %vm822_vm4, %v820_v7 }
 0x3f8   : > { %v824_v8 = vld [vmem:[#allocation3] sm:$0xff] }
 0x3f9   : > { %873 = vmatmul.f32.vlgmr.msra.gmra.mxu0 %v824_v8  ;;  %893 = vmatmul.f32.vlgmr.msra.gmra.mxu1 %v824_v8 }
 0x476   : > { %v874_v9 = vpop.f32.mrf.mxu0  ;;  %v894_v10 = vpop.f32.mrf.mxu1 }
 0x477   : > { %897 = vst [vmem:[%s297_s8] sm:$0xff] %v874_v9 }
 0x478   : > { %898 = vst [vmem:[%s297_s8 + $0x8] sm:$0xff] %v894_v10 }
 0x479   : > { %1331 = shalt.err (!%p1328_p13)
}
 0x47a   : > { %1084 = dma.vmem_to_hbm [thread:$0]  (%p1508_p2), %s916_s9, 256, %s918_s10, %s900_s11  }
 0x47b PF: > { %s929_s14 = sand.u32 1, %s1378_s15   ;;  %p1101_p0 = pnand %p1044_p6, %p1515_p5 }
 0x47c   : > { %s930_s3 = scalar_lea.sflag [#allocation6], %s929_s14 }
 0x47d   : > { %p1102_p4 = pneg %p1101_p0 }
 0x47f   : > { %1373 = dma.done.wait (%p1102_p4), %s930_s3, 256  }
 0x480   : > { %1375 = vsyncadd (%p1102_p4), %s930_s3, 4294967040  ;;  %s24_s20 = sadd.s32 1, %s1398_s20   ;;  %s1667_s17 = sld [smem:[#allocation18_spill]] }
 0x481   : > { %p21_p7 = scmp.ge.s32.totalorder %s24_s20, 4   ;;  %s1668_s25 = sld [smem:[#allocation20_spill]] }
 0x482   : > { %s1669_s24 = sld [smem:[#allocation19_spill]]  ;;  %s1670_s15 = smov %s1382_s16 }
 0x483   : > { %s1673_s18 = smov %s1394_s19 }
 0x484   :  { %23 = sbr.rel (!%p21_p7) target bundleno = 12 (0xc), region = 107 }
 0x486   : > { %s1671_s16 = smov %s1667_s17 }
 0x487   : > { %s1672_s17 = smov %s1668_s25 }
 0x488   : > { %s1674_s19 = smov %s1669_s24 }
 0x489   :  { %936 = vsyncpa [#allocation5], 1 }
 0x48a   :  { %938 = vsyncpa [#allocation5 + $0x1], 1 }
 0x48b   :  { %939 = vsyncpa [#allocation8], 1 }
 0x48c   :  { %941 = vsyncpa [#allocation8 + $0x1], 1 }
 0x48d   :  { %942 = vsyncpa [#allocation11], 1 }
 0x48e   :  { %943 = vsyncpa [#allocation6], 1 }
 0x48f   :  { %945 = vsyncpa [#allocation6 + $0x1], 1 }

</bundles_post_ra>
